<compile_context>
chip_gen: v7x
topology: tpu7x:2x2x1
jax: 0.10.0
libtpu: 0.0.40
codegen_flags: <defaults>
</compile_context>

<pallas_src>
import math
import functools

import jax
import jax.numpy as jnp
from jax.experimental import pallas as pl
from jax.experimental.pallas import tpu as pltpu


# ----------------------------------------------------------------------------
# Kernel
# ----------------------------------------------------------------------------
def _nce_kernel(hidden_ref, tw_ref, tbf_ref, kptn_ref,
                nwt_ref, nbf_ref, kpn_ref, logkpn_ref,
                out_ref, *, n_rows, n_noise, tm, ck):
    f32 = jnp.float32
    MIN_PROB = 1e-9

    hidden_bf = hidden_ref[...]            # (TM, H)  bf16 hidden states
    tw_bf = tw_ref[...]                    # (TM, H)  bf16 gathered target rows
    tb = tbf_ref[...]                      # (TM, 1)  f32 target bias - norm_term
    k_ptn = kptn_ref[...]                  # (TM, 1)  f32 noise_ratio * q(target)

    # Rows past M in the last partial tile hold garbage; mask with a select
    # (do NOT replace with multiply-by-zero: 0 * NaN = NaN).
    row_ids = (pl.program_id(0) * tm
               + jax.lax.broadcasted_iota(jnp.int32, (tm, 1), 0))
    row_ok = row_ids < n_rows                                        # (TM, 1)

    # --- target term: bf16 multiply, f32 accumulation (_get_prob + BCE) ---
    target_score = jnp.sum(hidden_bf * tw_bf, axis=-1, keepdims=True,
                           dtype=f32) + tb                           # (TM, 1)
    p_model = jnp.clip(jnp.exp(target_score), MIN_PROB, 1.0)
    #   log(p_true_tgt) = log(p_model) - log(p_model + k*q_tgt), clamp at -100
    log_p_tgt = jnp.maximum(
        jnp.log(p_model) - jnp.log(p_model + k_ptn), -100.0)         # (TM, 1)
    ll_sum = jnp.sum(jnp.where(row_ok, log_p_tgt, 0.0))

    # --- noise term, chunked over the (padded, 256-aligned) noise axis ---
    kp = nwt_ref.shape[-1]
    for c0 in range(0, kp, ck):
        nwt_c = nwt_ref[:, c0:c0 + ck]                # (H, CK) bf16 noise rows^T
        nb_c = nbf_ref[:, c0:c0 + ck]                 # (1, CK) bias - norm_term
        kpn_c = kpn_ref[:, c0:c0 + ck]                # (1, CK) k * q_noise
        logkpn_c = logkpn_ref[:, c0:c0 + ck]          # (1, CK) log(k * q_noise)

        # bf16 x bf16 MXU matmul, f32 accumulation; no in-kernel transpose.
        score_c = jnp.dot(hidden_bf, nwt_c,
                          preferred_element_type=f32) + nb_c         # (TM, CK)
        p_nm = jnp.clip(jnp.exp(score_c), MIN_PROB, 1.0)
        #   log(1 - p_true_noise) = log(k*q) - log(p_nm + k*q), clamp at -100
        log_1m = jnp.maximum(logkpn_c - jnp.log(p_nm + kpn_c), -100.0)

        col_ok = (c0 + jax.lax.broadcasted_iota(jnp.int32, (1, ck), 1)) < n_noise
        mask = jnp.logical_and(row_ok, col_ok)
        ll_sum = ll_sum + jnp.sum(jnp.where(mask, log_1m, 0.0))

    # Per-tile partial of the negative log-likelihood sum.
    # TODO(synk): an SMEM (1,1) scalar output block would avoid this lane
    # broadcast; kept as a lane-dense VMEM block for lowering robustness.
    out_ref[...] = jnp.full((1, 1, 128), -ll_sum, dtype=f32)


# ----------------------------------------------------------------------------
# Wrapper helpers
# ----------------------------------------------------------------------------
def _vmem_budget_and_limit():
    """Generation-aware (budget, vmem_limit, capacity) in bytes."""
    cap = 128 << 20
    try:
        info = pltpu.get_tpu_info()
        c = getattr(info, "vmem_capacity_bytes", None)
        if c:
            cap = int(c)
    except Exception:
        pass
    if cap >= (100 << 20):            # v5e / v6e: 128 MiB physical VMEM
        return 80 << 20, 96 << 20, cap
    return 36 << 20, 44 << 20, cap    # v7x-like: 64 MiB physical VMEM


def _pick_tile_m(M, H, Kp, ck, budget_bytes, noise_buffers):
    """Largest M-tile whose working set fits the VMEM budget."""
    def est(tm):
        per_step = 2 * tm * H * 2          # hidden + target rows (bf16)
        per_step += 2 * tm * 512           # two (TM,1) f32 blocks, lane-padded
        per_step += 128 * 4                # (1,1,128) f32 output block
        resident = noise_buffers * (H * Kp * 2 + 3 * 8 * Kp * 4)
        work = tm * H * 2                  # bf16 product temporary
        work += 6 * tm * 512               # (TM,1) f32 chain (lane-padded)
        work += 6 * tm * ck * 4            # per-chunk (TM,CK) f32 chain
        return 2 * per_step + resident + work

    if M < 8:
        return max(int(M), 1)
    for tm in (8192, 4096, 2048, 1024, 512, 256, 128, 64, 32, 16, 8):
        if tm <= M and est(tm) <= budget_bytes:
            return tm
    return 8


# ----------------------------------------------------------------------------
# Wrapper
# ----------------------------------------------------------------------------
def nce_loss_pallas(hidden, target_w, target_b, noise_w, noise_b,
                    prob_noise, prob_target_in_noise, *, norm_term, noise_ratio):
    f32 = jnp.float32
    M, H = hidden.shape
    K = noise_w.shape[0]
    CK = 256                                     # in-kernel noise chunk width
    Kp = max(CK, ((K + CK - 1) // CK) * CK)      # 256-aligned noise axis

    budget, vmem_limit, vmem_cap = _vmem_budget_and_limit()
    two_cores = vmem_cap < (100 << 20)           # proxy: small-VMEM part => 2 TCs

    # Layout plumbing (once, in the wrapper): bf16 big streams, pre-transposed
    # lane-padded noise block, norm_term folded into biases, k*q and log(k*q)
    # precomputed.  Padding columns use (w=0, b=0, k*q=1, log(k*q)=0) so they
    # stay finite; they are masked out inside the kernel.
    k = float(noise_ratio)
    hid_bf = hidden.astype(jnp.bfloat16)
    tw_bf = target_w.astype(jnp.bfloat16)
    tb_fold = target_b.reshape(M, 1).astype(f32) - f32(norm_term)
    k_ptn = f32(k) * prob_target_in_noise.reshape(M, 1).astype(f32)
    nwt_bf = jnp.zeros((H, Kp), jnp.bfloat16).at[:, :K].set(
        noise_w.T.astype(jnp.bfloat16))
    nb_fold = jnp.zeros((1, Kp), f32).at[:, :K].set(
        noise_b.reshape(1, K).astype(f32) - f32(norm_term))
    kq = f32(k) * prob_noise.reshape(1, K).astype(f32)
    k_pn = jnp.ones((1, Kp), f32).at[:, :K].set(kq)
    log_k_pn = jnp.zeros((1, Kp), f32).at[:, :K].set(jnp.log(kq))

    def run(noise_buffers):
        TM = _pick_tile_m(M, H, Kp, CK, budget, noise_buffers)
        if two_cores and M >= 16:
            # keep >= 2 grid steps so both TensorCores get work (parallel axis)
            TM = min(TM, ((M + 1) // 2 + 7) // 8 * 8)
        num_tiles = (M + TM - 1) // TM

        kernel = functools.partial(_nce_kernel, n_rows=int(M), n_noise=int(K),
                                   tm=int(TM), ck=int(CK))

        row_spec_h = pl.BlockSpec((TM, H), lambda i: (i, 0))
        row_spec_1 = pl.BlockSpec((TM, 1), lambda i: (i, 0))
        inv = lambda i: (0, 0)
        noise_kw = {}
        if noise_buffers == 1:
            # grid-invariant blocks: single buffer, DMA'd once
            noise_kw = dict(pipeline_mode=pl.Buffered(1))
        noise_specs = [pl.BlockSpec((H, Kp), inv, **noise_kw),
                       pl.BlockSpec((1, Kp), inv, **noise_kw),
                       pl.BlockSpec((1, Kp), inv, **noise_kw),
                       pl.BlockSpec((1, Kp), inv, **noise_kw)]

        return pl.pallas_call(
            kernel,
            out_shape=jax.ShapeDtypeStruct((num_tiles, 1, 128), f32),
            grid=(num_tiles,),
            in_specs=[row_spec_h,    # hidden              (bf16)
                      row_spec_h,    # gathered target rows (bf16)
                      row_spec_1,    # target bias - lnZ    (f32)
                      row_spec_1,    # k * q(target)        (f32)
                      *noise_specs], # noise^T / bias-lnZ / k*q / log(k*q)
            out_specs=pl.BlockSpec((1, 1, 128), lambda i: (i, 0, 0)),
            compiler_params=pltpu.CompilerParams(
                dimension_semantics=("parallel",),
                vmem_limit_bytes=int(vmem_limit)),
        )(hid_bf, tw_bf, tb_fold, k_ptn, nwt_bf, nb_fold, k_pn, log_k_pn)

    try:
        partials = run(noise_buffers=1)
        jax.block_until_ready(partials)
    except Exception:
        # pipeline_mode=pl.Buffered(1) unsupported -> default double buffering
        partials = run(noise_buffers=2)

    # reduction='elementwise_mean' over the (B, N) per-token losses
    return jnp.sum(partials[:, 0, 0]) / f32(M)


# ----------------------------------------------------------------------------
# Pure-JAX mirror of the torch code path (for correctness check).
# It applies the same dtype policy the kernel uses for the big streams
# (bf16 hidden/target/noise rows, bf16 target product, f32 everywhere else),
# so the comparison tests the kernel math rather than the dtype policy.
# ----------------------------------------------------------------------------
def nce_loss_reference(hidden, target_w, target_b, noise_w, noise_b,
                       prob_noise, prob_tgt_in_noise, *, norm_term, noise_ratio):
    f32 = jnp.float32
    M = hidden.shape[0]
    K = noise_w.shape[0]
    hid_bf = hidden.astype(jnp.bfloat16)
    tw_bf = target_w.astype(jnp.bfloat16)
    nw_f = noise_w.astype(jnp.bfloat16).astype(f32)

    t_score = jnp.sum((hid_bf * tw_bf).astype(f32), axis=-1, keepdims=True) \
        + target_b                                                    # (M,1)
    n_score = hid_bf.astype(f32) @ nw_f.T + noise_b                   # (M,K)
    p_model = jnp.clip(jnp.exp(t_score - norm_term), 1e-9, 1.0)
    p_nm = jnp.clip(jnp.exp(n_score - norm_term), 1e-9, 1.0)
    pm = jnp.concatenate([p_model, p_nm], axis=1)
    pn = jnp.concatenate([prob_tgt_in_noise,
                          jnp.broadcast_to(prob_noise, (M, K))], axis=1)
    p_true = pm / (pm + noise_ratio * pn)
    label = jnp.concatenate([jnp.ones((M, 1)), jnp.zeros((M, K))], axis=1)
    bce = -(label * jnp.maximum(jnp.log(p_true), -100.0)
            + (1.0 - label) * jnp.maximum(jnp.log(1.0 - p_true), -100.0))
    return bce.sum(axis=1).mean()


if __name__ == "__main__":
    # Small shapes: batch=2, seq=8, hidden=32, vocab=64, noise_ratio=16
    B, N, H, V, K = 2, 8, 32, 64, 16
    key = jax.random.PRNGKey(0)
    k1, k2, k3, k4, k5, k6 = jax.random.split(key, 6)

    # `noise` buffer: a probability distribution over the vocabulary
    noise = jax.nn.softmax(jax.random.normal(k1, (V,), jnp.float32))

    # Deterministic "IndexLinear" parameters (embedding weight + bias)
    emb_w = 0.1 * jax.random.normal(k2, (V, H), jnp.float32)
    emb_b = 0.1 * jax.random.normal(k3, (V,), jnp.float32)

    # Forward inputs: target indices (B, N) and hidden states (B, N, H)
    target = jax.random.randint(k4, (B, N), 0, V)
    hidden = jax.random.normal(k5, (B, N, H), jnp.float32)

    # get_noise with per_word=False: one set of K samples shared by all (b, n).
    # TODO(synk): AliasMultinomial alias-table sampling replaced by
    # jax.random.choice over the same distribution (sampling is host-side glue).
    noise_samples = jax.random.choice(k6, V, (K,), p=noise)

    norm_term = math.log(V)  # norm_term='auto'

    # Glue gathers (plain JAX) feeding the kernel.
    # TODO(synk): target-row gather (emb_w[tgt]) could be fused into the kernel
    # via scalar prefetch + per-row DMA gather; kept in XLA for simplicity.
    M = B * N
    hid2d = hidden.reshape(M, H)
    tgt_flat = target.reshape(M)
    target_w = emb_w[tgt_flat]                         # (M, H)
    target_b = emb_b[tgt_flat].reshape(M, 1)           # (M, 1)
    noise_w = emb_w[noise_samples]                     # (K, H)
    noise_b = emb_b[noise_samples].reshape(1, K)       # (1, K)
    prob_noise = noise[noise_samples].reshape(1, K)    # (1, K)
    prob_tgt_in_noise = noise[tgt_flat].reshape(M, 1)  # (M, 1)

    loss = nce_loss_pallas(hid2d, target_w, target_b, noise_w, noise_b,
                           prob_noise, prob_tgt_in_noise,
                           norm_term=norm_term, noise_ratio=K)
    loss = jax.block_until_ready(loss)

    ref = nce_loss_reference(hid2d, target_w, target_b, noise_w, noise_b,
                             prob_noise, prob_tgt_in_noise,
                             norm_term=norm_term, noise_ratio=K)

    err = abs(float(loss) - float(ref))
    assert err < 1e-3 * max(1.0, abs(float(ref))), (float(loss), float(ref))
    print("KERNEL_OK")
</pallas_src>

<mosaic_0001>
module attributes {stable_mosaic.version = 11 : i64} {
  func.func @_nce_kernel(%arg0: i32, %arg1: memref<16x32xbf16, #tpu.memory_space<vmem>>, %arg2: memref<16x32xbf16, #tpu.memory_space<vmem>>, %arg3: memref<16x1xf32, #tpu.memory_space<vmem>>, %arg4: memref<16x1xf32, #tpu.memory_space<vmem>>, %arg5: memref<32x256xbf16, #tpu.memory_space<vmem>>, %arg6: memref<1x256xf32, #tpu.memory_space<vmem>>, %arg7: memref<1x256xf32, #tpu.memory_space<vmem>>, %arg8: memref<1x256xf32, #tpu.memory_space<vmem>>, %arg9: memref<1x1x128xf32, #tpu.memory_space<vmem>>) attributes {dimension_semantics = [#tpu.dimension_semantics<parallel>], iteration_bounds = array<i64: 1>, scalar_prefetch = 0 : i64, scratch_operands = 0 : i64, tpu.core_type = #tpu.core_type<tc>, window_params = [{transform_indices = @transform_0, window_bounds = array<i64: 16, 32>}, {transform_indices = @transform_1, window_bounds = array<i64: 16, 32>}, {transform_indices = @transform_2, window_bounds = array<i64: 16, 1>}, {transform_indices = @transform_3, window_bounds = array<i64: 16, 1>}, {pipeline_mode = #tpu.pipeline_mode<synchronous>, transform_indices = @transform_4, window_bounds = array<i64: 32, 256>}, {pipeline_mode = #tpu.pipeline_mode<synchronous>, transform_indices = @transform_5, window_bounds = array<i64: 1, 256>}, {pipeline_mode = #tpu.pipeline_mode<synchronous>, transform_indices = @transform_6, window_bounds = array<i64: 1, 256>}, {pipeline_mode = #tpu.pipeline_mode<synchronous>, transform_indices = @transform_7, window_bounds = array<i64: 1, 256>}, {transform_indices = @transform_8, window_bounds = array<i64: 1, 1, 128>}]} {
    %c0 = arith.constant 0 : index
    %c0_0 = arith.constant 0 : index
    %0 = vector.load %arg1[%c0, %c0_0] : memref<16x32xbf16, #tpu.memory_space<vmem>>, vector<16x32xbf16>
    %c0_1 = arith.constant 0 : index
    %c0_2 = arith.constant 0 : index
    %1 = vector.load %arg2[%c0_1, %c0_2] : memref<16x32xbf16, #tpu.memory_space<vmem>>, vector<16x32xbf16>
    %c0_3 = arith.constant 0 : index
    %c0_4 = arith.constant 0 : index
    %2 = vector.load %arg3[%c0_3, %c0_4] : memref<16x1xf32, #tpu.memory_space<vmem>>, vector<16x1xf32>
    %c0_5 = arith.constant 0 : index
    %c0_6 = arith.constant 0 : index
    %3 = vector.load %arg4[%c0_5, %c0_6] : memref<16x1xf32, #tpu.memory_space<vmem>>, vector<16x1xf32>
    %c16_i32 = arith.constant 16 : i32
    %4 = arith.muli %arg0, %c16_i32 : i32
    %5 = tpu.iota {dimensions = array<i32: 0>} : vector<16x1xi32>
    %6 = vector.broadcast %4 : i32 to vector<16x1xi32>
    %7 = arith.addi %6, %5 : vector<16x1xi32>
    %c16_i32_7 = arith.constant 16 : i32
    %8 = vector.broadcast %c16_i32_7 : i32 to vector<16x1xi32>
    %9 = arith.cmpi slt, %7, %8 : vector<16x1xi32>
    %10 = arith.mulf %0, %1 : vector<16x32xbf16>
    %11 = arith.extf %10 : vector<16x32xbf16> to vector<16x32xf32>
    %cst = arith.constant dense<0.000000e+00> : vector<16xf32>
    %12 = vector.multi_reduction <add>, %11, %cst [1] : vector<16x32xf32> to vector<16xf32>
    %13 = vector.shape_cast %12 : vector<16xf32> to vector<16x1xf32>
    %14 = arith.addf %13, %2 : vector<16x1xf32>
    %15 = math.exp %14 : vector<16x1xf32>
    %cst_8 = arith.constant 9.99999971E-10 : f32
    %cst_9 = arith.constant 1.000000e+00 : f32
    %16 = vector.broadcast %cst_8 : f32 to vector<16x1xf32>
    %17 = arith.maximumf %16, %15 : vector<16x1xf32>
    %18 = vector.broadcast %cst_9 : f32 to vector<16x1xf32>
    %19 = arith.minimumf %18, %17 : vector<16x1xf32>
    %20 = math.log %19 : vector<16x1xf32>
    %21 = arith.addf %19, %3 : vector<16x1xf32>
    %22 = math.log %21 : vector<16x1xf32>
    %23 = arith.subf %20, %22 : vector<16x1xf32>
    %cst_10 = arith.constant -1.000000e+02 : f32
    %24 = vector.broadcast %cst_10 : f32 to vector<16x1xf32>
    %25 = arith.maximumf %23, %24 : vector<16x1xf32>
    %cst_11 = arith.constant 0.000000e+00 : f32
    %26 = vector.broadcast %cst_11 : f32 to vector<16x1xf32>
    %27 = arith.select %9, %25, %26 : vector<16x1xi1>, vector<16x1xf32>
    %28 = vector.shape_cast %27 : vector<16x1xf32> to vector<1x16x1xf32>
    %cst_12 = arith.constant dense<0.000000e+00> : vector<1xf32>
    %29 = vector.multi_reduction <add>, %28, %cst_12 [1, 2] : vector<1x16x1xf32> to vector<1xf32>
    %30 = vector.shape_cast %29 : vector<1xf32> to vector<1x1x1xf32>
    %31 = vector.extract %30[0, 0, 0] : f32 from vector<1x1x1xf32>
    %c0_13 = arith.constant 0 : index
    %c0_14 = arith.constant 0 : index
    %32 = vector.load %arg5[%c0_13, %c0_14] : memref<32x256xbf16, #tpu.memory_space<vmem>>, vector<32x256xbf16>
    %c0_15 = arith.constant 0 : index
    %c0_16 = arith.constant 0 : index
    %33 = vector.load %arg6[%c0_15, %c0_16] : memref<1x256xf32, #tpu.memory_space<vmem>>, vector<1x256xf32>
    %c0_17 = arith.constant 0 : index
    %c0_18 = arith.constant 0 : index
    %34 = vector.load %arg7[%c0_17, %c0_18] : memref<1x256xf32, #tpu.memory_space<vmem>>, vector<1x256xf32>
    %c0_19 = arith.constant 0 : index
    %c0_20 = arith.constant 0 : index
    %35 = vector.load %arg8[%c0_19, %c0_20] : memref<1x256xf32, #tpu.memory_space<vmem>>, vector<1x256xf32>
    %cst_21 = arith.constant dense<0.000000e+00> : vector<16x256xf32>
    %36 = tpu.matmul %0, %32, %cst_21 {dimension_numbers = #tpu.dot_dimension_numbers<[1], [0], [0], [1], [0, 0, 1, 1], [], []>} : vector<16x32xbf16>, vector<32x256xbf16>, vector<16x256xf32> -> vector<16x256xf32>
    %37 = vector.broadcast %33 : vector<1x256xf32> to vector<16x256xf32>
    %38 = arith.addf %36, %37 : vector<16x256xf32>
    %39 = math.exp %38 : vector<16x256xf32>
    %cst_22 = arith.constant 9.99999971E-10 : f32
    %cst_23 = arith.constant 1.000000e+00 : f32
    %40 = vector.broadcast %cst_22 : f32 to vector<16x256xf32>
    %41 = arith.maximumf %40, %39 : vector<16x256xf32>
    %42 = vector.broadcast %cst_23 : f32 to vector<16x256xf32>
    %43 = arith.minimumf %42, %41 : vector<16x256xf32>
    %44 = vector.broadcast %34 : vector<1x256xf32> to vector<16x256xf32>
    %45 = arith.addf %43, %44 : vector<16x256xf32>
    %46 = math.log %45 : vector<16x256xf32>
    %47 = vector.broadcast %35 : vector<1x256xf32> to vector<16x256xf32>
    %48 = arith.subf %47, %46 : vector<16x256xf32>
    %cst_24 = arith.constant -1.000000e+02 : f32
    %49 = vector.broadcast %cst_24 : f32 to vector<16x256xf32>
    %50 = arith.maximumf %48, %49 : vector<16x256xf32>
    %51 = tpu.iota {dimensions = array<i32: 1>} : vector<1x256xi32>
    %c0_i32 = arith.constant 0 : i32
    %52 = vector.broadcast %c0_i32 : i32 to vector<1x256xi32>
    %53 = arith.addi %52, %51 : vector<1x256xi32>
    %c16_i32_25 = arith.constant 16 : i32
    %54 = vector.broadcast %c16_i32_25 : i32 to vector<1x256xi32>
    %55 = arith.cmpi slt, %53, %54 : vector<1x256xi32>
    %56 = vector.broadcast %9 : vector<16x1xi1> to vector<16x256xi1>
    %57 = vector.broadcast %55 : vector<1x256xi1> to vector<16x256xi1>
    %58 = arith.andi %56, %57 : vector<16x256xi1>
    %cst_26 = arith.constant 0.000000e+00 : f32
    %59 = vector.broadcast %cst_26 : f32 to vector<16x256xf32>
    %60 = arith.select %58, %50, %59 : vector<16x256xi1>, vector<16x256xf32>
    %61 = vector.shape_cast %60 : vector<16x256xf32> to vector<1x16x256xf32>
    %cst_27 = arith.constant dense<0.000000e+00> : vector<1xf32>
    %62 = vector.multi_reduction <add>, %61, %cst_27 [1, 2] : vector<1x16x256xf32> to vector<1xf32>
    %63 = vector.shape_cast %62 : vector<1xf32> to vector<1x1x1xf32>
    %64 = vector.extract %63[0, 0, 0] : f32 from vector<1x1x1xf32>
    %65 = arith.addf %31, %64 : f32
    %cst_28 = arith.constant 0.000000e+00 : f32
    %66 = arith.subf %cst_28, %65 : f32
    %67 = vector.broadcast %66 : f32 to vector<1x1x128xf32>
    %c0_29 = arith.constant 0 : index
    %c0_30 = arith.constant 0 : index
    %c0_31 = arith.constant 0 : index
    %68 = vector.load %arg9[%c0_29, %c0_30, %c0_31] : memref<1x1x128xf32, #tpu.memory_space<vmem>>, vector<1x1x128xf32>
    tpu.vector_store %arg9[%c0_29, %c0_30, %c0_31], %67 {strides = array<i32>} : memref<1x1x128xf32, #tpu.memory_space<vmem>>, vector<1x1x128xf32>,
    return
  }
  func.func @transform_0(%arg0: i32) -> (i32, i32) {
    %c0_i32 = arith.constant 0 : i32
    %c0_i32_0 = arith.constant 0 : i32
    return %arg0, %c0_i32 : i32, i32
  }
  func.func @transform_1(%arg0: i32) -> (i32, i32) {
    %c0_i32 = arith.constant 0 : i32
    %c0_i32_0 = arith.constant 0 : i32
    return %arg0, %c0_i32 : i32, i32
  }
  func.func @transform_2(%arg0: i32) -> (i32, i32) {
    %c0_i32 = arith.constant 0 : i32
    %c0_i32_0 = arith.constant 0 : i32
    return %arg0, %c0_i32 : i32, i32
  }
  func.func @transform_3(%arg0: i32) -> (i32, i32) {
    %c0_i32 = arith.constant 0 : i32
    %c0_i32_0 = arith.constant 0 : i32
    return %arg0, %c0_i32 : i32, i32
  }
  func.func @transform_4(%arg0: i32) -> (i32, i32) {
    %c0_i32 = arith.constant 0 : i32
    %c0_i32_0 = arith.constant 0 : i32
    %c0_i32_1 = arith.constant 0 : i32
    return %c0_i32, %c0_i32_0 : i32, i32
  }
  func.func @transform_5(%arg0: i32) -> (i32, i32) {
    %c0_i32 = arith.constant 0 : i32
    %c0_i32_0 = arith.constant 0 : i32
    %c0_i32_1 = arith.constant 0 : i32
    return %c0_i32, %c0_i32_0 : i32, i32
  }
  func.func @transform_6(%arg0: i32) -> (i32, i32) {
    %c0_i32 = arith.constant 0 : i32
    %c0_i32_0 = arith.constant 0 : i32
    %c0_i32_1 = arith.constant 0 : i32
    return %c0_i32, %c0_i32_0 : i32, i32
  }
  func.func @transform_7(%arg0: i32) -> (i32, i32) {
    %c0_i32 = arith.constant 0 : i32
    %c0_i32_0 = arith.constant 0 : i32
    %c0_i32_1 = arith.constant 0 : i32
    return %c0_i32, %c0_i32_0 : i32, i32
  }
  func.func @transform_8(%arg0: i32) -> (i32, i32, i32) {
    %c0_i32 = arith.constant 0 : i32
    %c0_i32_0 = arith.constant 0 : i32
    %c0_i32_1 = arith.constant 0 : i32
    return %arg0, %c0_i32, %c0_i32_0 : i32, i32, i32
  }
}

module attributes {stable_mosaic.version = 11 : i64} {
  func.func @_nce_kernel(%arg0: i32, %arg1: memref<16x32xbf16, #tpu.memory_space<vmem>>, %arg2: memref<16x32xbf16, #tpu.memory_space<vmem>>, %arg3: memref<16x1xf32, #tpu.memory_space<vmem>>, %arg4: memref<16x1xf32, #tpu.memory_space<vmem>>, %arg5: memref<32x256xbf16, #tpu.memory_space<vmem>>, %arg6: memref<1x256xf32, #tpu.memory_space<vmem>>, %arg7: memref<1x256xf32, #tpu.memory_space<vmem>>, %arg8: memref<1x256xf32, #tpu.memory_space<vmem>>, %arg9: memref<1x1x128xf32, #tpu.memory_space<vmem>>) attributes {dimension_semantics = [#tpu.dimension_semantics<parallel>], iteration_bounds = array<i64: 1>, scalar_prefetch = 0 : i64, scratch_operands = 0 : i64, tpu.core_type = #tpu.core_type<tc>, window_params = [{transform_indices = @transform_0, window_bounds = array<i64: 16, 32>}, {transform_indices = @transform_1, window_bounds = array<i64: 16, 32>}, {transform_indices = @transform_2, window_bounds = array<i64: 16, 1>}, {transform_indices = @transform_3, window_bounds = array<i64: 16, 1>}, {pipeline_mode = #tpu.pipeline_mode<synchronous>, transform_indices = @transform_4, window_bounds = array<i64: 32, 256>}, {pipeline_mode = #tpu.pipeline_mode<synchronous>, transform_indices = @transform_5, window_bounds = array<i64: 1, 256>}, {pipeline_mode = #tpu.pipeline_mode<synchronous>, transform_indices = @transform_6, window_bounds = array<i64: 1, 256>}, {pipeline_mode = #tpu.pipeline_mode<synchronous>, transform_indices = @transform_7, window_bounds = array<i64: 1, 256>}, {transform_indices = @transform_8, window_bounds = array<i64: 1, 1, 128>}]} {
    %c0 = arith.constant 0 : index
    %c0_0 = arith.constant 0 : index
    %0 = vector.load %arg1[%c0, %c0_0] : memref<16x32xbf16, #tpu.memory_space<vmem>>, vector<16x32xbf16>
    %c0_1 = arith.constant 0 : index
    %c0_2 = arith.constant 0 : index
    %1 = vector.load %arg2[%c0_1, %c0_2] : memref<16x32xbf16, #tpu.memory_space<vmem>>, vector<16x32xbf16>
    %c0_3 = arith.constant 0 : index
    %c0_4 = arith.constant 0 : index
    %2 = vector.load %arg3[%c0_3, %c0_4] : memref<16x1xf32, #tpu.memory_space<vmem>>, vector<16x1xf32>
    %c0_5 = arith.constant 0 : index
    %c0_6 = arith.constant 0 : index
    %3 = vector.load %arg4[%c0_5, %c0_6] : memref<16x1xf32, #tpu.memory_space<vmem>>, vector<16x1xf32>
    %c16_i32 = arith.constant 16 : i32
    %4 = arith.muli %arg0, %c16_i32 : i32
    %5 = tpu.iota {dimensions = array<i32: 0>} : vector<16x1xi32>
    %6 = vector.broadcast %4 : i32 to vector<16x1xi32>
    %7 = arith.addi %6, %5 : vector<16x1xi32>
    %c16_i32_7 = arith.constant 16 : i32
    %8 = vector.broadcast %c16_i32_7 : i32 to vector<16x1xi32>
    %9 = arith.cmpi slt, %7, %8 : vector<16x1xi32>
    %10 = arith.mulf %0, %1 : vector<16x32xbf16>
    %11 = arith.extf %10 : vector<16x32xbf16> to vector<16x32xf32>
    %cst = arith.constant dense<0.000000e+00> : vector<16xf32>
    %12 = vector.multi_reduction <add>, %11, %cst [1] : vector<16x32xf32> to vector<16xf32>
    %13 = vector.shape_cast %12 : vector<16xf32> to vector<16x1xf32>
    %14 = arith.addf %13, %2 : vector<16x1xf32>
    %15 = math.exp %14 : vector<16x1xf32>
    %cst_8 = arith.constant 9.99999971E-10 : f32
    %cst_9 = arith.constant 1.000000e+00 : f32
    %16 = vector.broadcast %cst_8 : f32 to vector<16x1xf32>
    %17 = arith.maximumf %16, %15 : vector<16x1xf32>
    %18 = vector.broadcast %cst_9 : f32 to vector<16x1xf32>
    %19 = arith.minimumf %18, %17 : vector<16x1xf32>
    %20 = math.log %19 : vector<16x1xf32>
    %21 = arith.addf %19, %3 : vector<16x1xf32>
    %22 = math.log %21 : vector<16x1xf32>
    %23 = arith.subf %20, %22 : vector<16x1xf32>
    %cst_10 = arith.constant -1.000000e+02 : f32
    %24 = vector.broadcast %cst_10 : f32 to vector<16x1xf32>
    %25 = arith.maximumf %23, %24 : vector<16x1xf32>
    %cst_11 = arith.constant 0.000000e+00 : f32
    %26 = vector.broadcast %cst_11 : f32 to vector<16x1xf32>
    %27 = arith.select %9, %25, %26 : vector<16x1xi1>, vector<16x1xf32>
    %28 = vector.shape_cast %27 : vector<16x1xf32> to vector<1x16x1xf32>
    %cst_12 = arith.constant dense<0.000000e+00> : vector<1xf32>
    %29 = vector.multi_reduction <add>, %28, %cst_12 [1, 2] : vector<1x16x1xf32> to vector<1xf32>
    %30 = vector.shape_cast %29 : vector<1xf32> to vector<1x1x1xf32>
    %31 = vector.extract %30[0, 0, 0] : f32 from vector<1x1x1xf32>
    %c0_13 = arith.constant 0 : index
    %c0_14 = arith.constant 0 : index
    %32 = vector.load %arg5[%c0_13, %c0_14] : memref<32x256xbf16, #tpu.memory_space<vmem>>, vector<32x256xbf16>
    %c0_15 = arith.constant 0 : index
    %c0_16 = arith.constant 0 : index
    %33 = vector.load %arg6[%c0_15, %c0_16] : memref<1x256xf32, #tpu.memory_space<vmem>>, vector<1x256xf32>
    %c0_17 = arith.constant 0 : index
    %c0_18 = arith.constant 0 : index
    %34 = vector.load %arg7[%c0_17, %c0_18] : memref<1x256xf32, #tpu.memory_space<vmem>>, vector<1x256xf32>
    %c0_19 = arith.constant 0 : index
    %c0_20 = arith.constant 0 : index
    %35 = vector.load %arg8[%c0_19, %c0_20] : memref<1x256xf32, #tpu.memory_space<vmem>>, vector<1x256xf32>
    %cst_21 = arith.constant dense<0.000000e+00> : vector<16x256xf32>
    %36 = tpu.matmul %0, %32, %cst_21 {dimension_numbers = #tpu.dot_dimension_numbers<[1], [0], [0], [1], [0, 0, 1, 1], [], []>} : vector<16x32xbf16>, vector<32x256xbf16>, vector<16x256xf32> -> vector<16x256xf32>
    %37 = vector.broadcast %33 : vector<1x256xf32> to vector<16x256xf32>
    %38 = arith.addf %36, %37 : vector<16x256xf32>
    %39 = math.exp %38 : vector<16x256xf32>
    %cst_22 = arith.constant 9.99999971E-10 : f32
    %cst_23 = arith.constant 1.000000e+00 : f32
    %40 = vector.broadcast %cst_22 : f32 to vector<16x256xf32>
    %41 = arith.maximumf %40, %39 : vector<16x256xf32>
    %42 = vector.broadcast %cst_23 : f32 to vector<16x256xf32>
    %43 = arith.minimumf %42, %41 : vector<16x256xf32>
    %44 = vector.broadcast %34 : vector<1x256xf32> to vector<16x256xf32>
    %45 = arith.addf %43, %44 : vector<16x256xf32>
    %46 = math.log %45 : vector<16x256xf32>
    %47 = vector.broadcast %35 : vector<1x256xf32> to vector<16x256xf32>
    %48 = arith.subf %47, %46 : vector<16x256xf32>
    %cst_24 = arith.constant -1.000000e+02 : f32
    %49 = vector.broadcast %cst_24 : f32 to vector<16x256xf32>
    %50 = arith.maximumf %48, %49 : vector<16x256xf32>
    %51 = tpu.iota {dimensions = array<i32: 1>} : vector<1x256xi32>
    %c0_i32 = arith.constant 0 : i32
    %52 = vector.broadcast %c0_i32 : i32 to vector<1x256xi32>
    %53 = arith.addi %52, %51 : vector<1x256xi32>
    %c16_i32_25 = arith.constant 16 : i32
    %54 = vector.broadcast %c16_i32_25 : i32 to vector<1x256xi32>
    %55 = arith.cmpi slt, %53, %54 : vector<1x256xi32>
    %56 = vector.broadcast %9 : vector<16x1xi1> to vector<16x256xi1>
    %57 = vector.broadcast %55 : vector<1x256xi1> to vector<16x256xi1>
    %58 = arith.andi %56, %57 : vector<16x256xi1>
    %cst_26 = arith.constant 0.000000e+00 : f32
    %59 = vector.broadcast %cst_26 : f32 to vector<16x256xf32>
    %60 = arith.select %58, %50, %59 : vector<16x256xi1>, vector<16x256xf32>
    %61 = vector.shape_cast %60 : vector<16x256xf32> to vector<1x16x256xf32>
    %cst_27 = arith.constant dense<0.000000e+00> : vector<1xf32>
    %62 = vector.multi_reduction <add>, %61, %cst_27 [1, 2] : vector<1x16x256xf32> to vector<1xf32>
    %63 = vector.shape_cast %62 : vector<1xf32> to vector<1x1x1xf32>
    %64 = vector.extract %63[0, 0, 0] : f32 from vector<1x1x1xf32>
    %65 = arith.addf %31, %64 : f32
    %cst_28 = arith.constant 0.000000e+00 : f32
    %66 = arith.subf %cst_28, %65 : f32
    %67 = vector.broadcast %66 : f32 to vector<1x1x128xf32>
    %c0_29 = arith.constant 0 : index
    %c0_30 = arith.constant 0 : index
    %c0_31 = arith.constant 0 : index
    %68 = vector.load %arg9[%c0_29, %c0_30, %c0_31] : memref<1x1x128xf32, #tpu.memory_space<vmem>>, vector<1x1x128xf32>
    tpu.vector_store %arg9[%c0_29, %c0_30, %c0_31], %67 {strides = array<i32>} : memref<1x1x128xf32, #tpu.memory_space<vmem>>, vector<1x1x128xf32>,
    return
  }
  func.func @transform_0(%arg0: i32) -> (i32, i32) {
    %c0_i32 = arith.constant 0 : i32
    %c0_i32_0 = arith.constant 0 : i32
    return %arg0, %c0_i32 : i32, i32
  }
  func.func @transform_1(%arg0: i32) -> (i32, i32) {
    %c0_i32 = arith.constant 0 : i32
    %c0_i32_0 = arith.constant 0 : i32
    return %arg0, %c0_i32 : i32, i32
  }
  func.func @transform_2(%arg0: i32) -> (i32, i32) {
    %c0_i32 = arith.constant 0 : i32
    %c0_i32_0 = arith.constant 0 : i32
    return %arg0, %c0_i32 : i32, i32
  }
  func.func @transform_3(%arg0: i32) -> (i32, i32) {
    %c0_i32 = arith.constant 0 : i32
    %c0_i32_0 = arith.constant 0 : i32
    return %arg0, %c0_i32 : i32, i32
  }
  func.func @transform_4(%arg0: i32) -> (i32, i32) {
    %c0_i32 = arith.constant 0 : i32
    %c0_i32_0 = arith.constant 0 : i32
    %c0_i32_1 = arith.constant 0 : i32
    return %c0_i32, %c0_i32_0 : i32, i32
  }
  func.func @transform_5(%arg0: i32) -> (i32, i32) {
    %c0_i32 = arith.constant 0 : i32
    %c0_i32_0 = arith.constant 0 : i32
    %c0_i32_1 = arith.constant 0 : i32
    return %c0_i32, %c0_i32_0 : i32, i32
  }
  func.func @transform_6(%arg0: i32) -> (i32, i32) {
    %c0_i32 = arith.constant 0 : i32
    %c0_i32_0 = arith.constant 0 : i32
    %c0_i32_1 = arith.constant 0 : i32
    return %c0_i32, %c0_i32_0 : i32, i32
  }
  func.func @transform_7(%arg0: i32) -> (i32, i32) {
    %c0_i32 = arith.constant 0 : i32
    %c0_i32_0 = arith.constant 0 : i32
    %c0_i32_1 = arith.constant 0 : i32
    return %c0_i32, %c0_i32_0 : i32, i32
  }
  func.func @transform_8(%arg0: i32) -> (i32, i32, i32) {
    %c0_i32 = arith.constant 0 : i32
    %c0_i32_0 = arith.constant 0 : i32
    %c0_i32_1 = arith.constant 0 : i32
    return %arg0, %c0_i32, %c0_i32_0 : i32, i32, i32
  }
}

</mosaic_0001>

<bundles_post_ra>
// kernel: tpu_custom_call.1
= control target key start
LH: loop header
LB: loop body
LE: loop exit
PB: predicated region body
PF: predicated region fallthrough
CT: control target
= control target key end

     0   :  { %13 = vsyncpa [#allocation3], 0  ;;  %s847_s0 = inlined_call_operand.hbm [shape: bf16[16,32], index: 0, kind: input, shape index: {}]   ;;  %s848_s1 = inlined_call_operand.hbm [shape: bf16[16,32], index: 1, kind: input, shape index: {}]   ;;  %s849_s2 = inlined_call_operand.hbm [shape: f32[16,1], index: 2, kind: input, shape index: {}]   ;;  %s850_s3 = inlined_call_operand.hbm [shape: f32[16,1], index: 3, kind: input, shape index: {}]   ;;  %s851_s4 = inlined_call_operand.hbm [shape: bf16[32,256], index: 4, kind: input, shape index: {}]   ;;  %s852_s5 = inlined_call_operand.hbm [shape: f32[1,256], index: 5, kind: input, shape index: {}]   ;;  %s853_s6 = inlined_call_operand.hbm [shape: f32[1,256], index: 6, kind: input, shape index: {}]   ;;  %s854_s7 = inlined_call_operand.hbm [shape: f32[1,256], index: 7, kind: input, shape index: {}]   ;;  %s855_s8 = inlined_call_operand.hbm [shape: f32[1,1,128], index: 8, kind: output, shape index: {}]  }
   0x1   :  { %14 = vsyncpa [#allocation6], 0 }
   0x2   :  { %15 = vsyncpa [#allocation9], 0 }
   0x3   :  { %16 = vsyncpa [#allocation12], 0 }
   0x4   :  { %17 = vsyncpa [#allocation15], 0 }
   0x5   :  { %18 = vsyncpa [#allocation4], 0  ;;  %s665_s27 = smov [#allocation5]   ;;  %s455_s9 = scalar_lea.hbm %s848_s1, 128 }
   0x6   :  { %s36_s28 = sshll.u32 %s665_s27, 4  ;;  %p456_p0 = scmp.ne.s32.totalorder %s848_s1, %s455_s9  ;;  %s37_s28 = int_to_ptr.vmem [resolvable:$true] %s36_s28 }
   0x7   :  { %p459_p1 = scmp.lt.u32.totalorder %s455_s9, %s848_s1 }
   0x9   :  { %p461_p2 = pnand %p459_p1, %p456_p0 }
   0xb   :  { %464 = shalt.err (!%p461_p2)
}
   0xc   :  { %s465_s14 = scalar_lea.vmem %s37_s28, 128  ;;  %p470_p4 = scmp.lt.s32.totalorder %s37_s28, %s37_s28 }
   0xd   :  { %p466_p3 = scmp.ne.s32.totalorder %s37_s28, %s465_s14  ;;  %p471_p5 = scmp.lt.s32.totalorder %s465_s14, %s465_s14 }
   0xf   :  { %p472_p6 = por %p471_p5, %p470_p4 }
  0x11   :  { %p473_p7 = pnand %p472_p6, %p466_p3 }
  0x13   :  { %476 = shalt.err (!%p473_p7)
}
  0x14   :  { %s666_s15 = smov 64   ;;  %s667_s16 = smov 4  }
  0x15   :  { %42 = dma.hbm_to_vmem [thread:$0]  %s848_s1, 128, %s37_s28, [#allocation6], %s666_s15, %s666_s15, %s667_s16  }
  0x16   :  { %s668_s19 = smov [#allocation8]   ;;  %s669_s21 = smov [#allocation11]  }
  0x17   :  { %s60_s20 = sshll.u32 %s668_s19, 4  ;;  %s85_s22 = sshll.u32 %s669_s21, 4  ;;  %s61_s20 = int_to_ptr.vmem [resolvable:$true] %s60_s20  ;;  %s86_s22 = int_to_ptr.vmem [resolvable:$true] %s85_s22 }
  0x18   :  { %s477_s25 = scalar_lea.hbm %s850_s3, 256 }
  0x19   :  { %p478_p8 = scmp.ne.s32.totalorder %s850_s3, %s477_s25  ;;  %p481_p9 = scmp.lt.u32.totalorder %s477_s25, %s850_s3 }
  0x1b   :  { %p483_p10 = pnand %p481_p9, %p478_p8 }
  0x1d   :  { %486 = shalt.err (!%p483_p10)
}
  0x1e   :  { %s487_s1 = scalar_lea.vmem %s61_s20, 256  ;;  %p492_p12 = scmp.lt.s32.totalorder %s61_s20, %s61_s20 }
  0x1f   :  { %p488_p11 = scmp.ne.s32.totalorder %s61_s20, %s487_s1  ;;  %p493_p13 = scmp.lt.s32.totalorder %s487_s1, %s487_s1 }
  0x21   :  { %p494_p0 = por %p493_p13, %p492_p12 }
  0x23   :  { %p495_p1 = pnand %p494_p0, %p488_p11 }
  0x25   :  { %498 = shalt.err (!%p495_p1)
}
  0x26   :  { %s670_s28 = smov 128   ;;  %s671_s9 = smov 8  }
  0x27   :  { %66 = dma.hbm_to_vmem [thread:$0]  %s850_s3, 256, %s61_s20, [#allocation9], %s670_s28, %s670_s28, %s671_s9  }
  0x28   :  { %s499_s14 = scalar_lea.hbm %s852_s5, 32 }
  0x29   :  { %p500_p2 = scmp.ne.s32.totalorder %s852_s5, %s499_s14  ;;  %p503_p3 = scmp.lt.u32.totalorder %s499_s14, %s852_s5 }
  0x2b   :  { %p505_p4 = pnand %p503_p3, %p500_p2 }
  0x2d   :  { %508 = shalt.err (!%p505_p4)
}
  0x2e   :  { %s509_s23 = scalar_lea.vmem %s86_s22, 32  ;;  %p514_p6 = scmp.lt.s32.totalorder %s86_s22, %s86_s22 }
  0x2f   :  { %p510_p5 = scmp.ne.s32.totalorder %s86_s22, %s509_s23  ;;  %p515_p7 = scmp.lt.s32.totalorder %s509_s23, %s509_s23 }
  0x31   :  { %p516_p8 = por %p515_p7, %p514_p6 }
  0x33   :  { %p517_p9 = pnand %p516_p8, %p510_p5 }
  0x35   :  { %520 = shalt.err (!%p517_p9)
}
  0x36   :  { %88 = dma.hbm_to_vmem [thread:$0]  %s852_s5, 32, %s86_s22, [#allocation12]  }
  0x37   :  { %s672_s24 = smov [#allocation2]   ;;  %s673_s26 = smov [#allocation7]  }
  0x38   :  { %s24_s25 = sshll.u32 %s672_s24, 4  ;;  %s48_s27 = sshll.u32 %s673_s26, 4  ;;  %s25_s25 = int_to_ptr.vmem [resolvable:$true] %s24_s25  ;;  %s49_s27 = int_to_ptr.vmem [resolvable:$true] %s48_s27 }
  0x39   :  { %s521_s1 = scalar_lea.hbm %s847_s0, 128 }
  0x3a   :  { %p522_p10 = scmp.ne.s32.totalorder %s847_s0, %s521_s1  ;;  %p525_p11 = scmp.lt.u32.totalorder %s521_s1, %s847_s0 }
  0x3c   :  { %p527_p12 = pnand %p525_p11, %p522_p10 }
  0x3e   :  { %530 = shalt.err (!%p527_p12)
}
  0x3f   :  { %s531_s5 = scalar_lea.vmem %s25_s25, 128  ;;  %p536_p0 = scmp.lt.s32.totalorder %s25_s25, %s25_s25 }
  0x40   :  { %p532_p13 = scmp.ne.s32.totalorder %s25_s25, %s531_s5  ;;  %p537_p1 = scmp.lt.s32.totalorder %s531_s5, %s531_s5 }
  0x42   :  { %p538_p2 = por %p537_p1, %p536_p0 }
  0x44   :  { %p539_p3 = pnand %p538_p2, %p532_p13 }
  0x46   :  { %542 = shalt.err (!%p539_p3)
}
  0x47   :  { %30 = dma.hbm_to_vmem [thread:$0]  %s847_s0, 128, %s25_s25, [#allocation3], %s666_s15, %s666_s15, %s667_s16  }
  0x48   :  { %s543_s19 = scalar_lea.hbm %s849_s2, 256 }
  0x49   :  { %p544_p4 = scmp.ne.s32.totalorder %s849_s2, %s543_s19  ;;  %p547_p5 = scmp.lt.u32.totalorder %s543_s19, %s849_s2 }
  0x4b   :  { %p549_p6 = pnand %p547_p5, %p544_p4 }
  0x4d   :  { %552 = shalt.err (!%p549_p6)
}
  0x4e   :  { %s553_s24 = scalar_lea.vmem %s49_s27, 256  ;;  %p558_p8 = scmp.lt.s32.totalorder %s49_s27, %s49_s27 }
  0x4f   :  { %p554_p7 = scmp.ne.s32.totalorder %s49_s27, %s553_s24  ;;  %p559_p9 = scmp.lt.s32.totalorder %s553_s24, %s553_s24 }
  0x51   :  { %p560_p10 = por %p559_p9, %p558_p8 }
  0x53   :  { %p561_p11 = pnand %p560_p10, %p554_p7 }
  0x55   :  { %564 = shalt.err (!%p561_p11)
}
  0x56   :  { %54 = dma.hbm_to_vmem [thread:$0]  %s849_s2, 256, %s49_s27, [#allocation6], %s670_s28, %s670_s28, %s671_s9  }
  0x57   :  { %s674_s16 = smov [#allocation10]   ;;  %s675_s26 = smov [#allocation13]  }
  0x58   :  { %s72_s25 = sshll.u32 %s674_s16, 4  ;;  %s95_s29 = sshll.u32 %s675_s26, 4  ;;  %s73_s25 = int_to_ptr.vmem [resolvable:$true] %s72_s25  ;;  %s96_s29 = int_to_ptr.vmem [resolvable:$true] %s95_s29 }
  0x59   :  { %s565_s10 = scalar_lea.hbm %s851_s4, 512 }
  0x5a   :  { %p566_p12 = scmp.ne.s32.totalorder %s851_s4, %s565_s10  ;;  %p569_p13 = scmp.lt.u32.totalorder %s565_s10, %s851_s4 }
  0x5c   :  { %p571_p0 = pnand %p569_p13, %p566_p12 }
  0x5e   :  { %574 = shalt.err (!%p571_p0)
}
  0x5f   :  { %s575_s2 = scalar_lea.vmem %s73_s25, 512  ;;  %p580_p2 = scmp.lt.s32.totalorder %s73_s25, %s73_s25 }
  0x60   :  { %p576_p1 = scmp.ne.s32.totalorder %s73_s25, %s575_s2  ;;  %p581_p3 = scmp.lt.s32.totalorder %s575_s2, %s575_s2 }
  0x62   :  { %p582_p4 = por %p581_p3, %p580_p2 }
  0x64   :  { %p583_p5 = pnand %p582_p4, %p576_p1 }
  0x66   :  { %586 = shalt.err (!%p583_p5)
}
  0x67   :  { %78 = dma.hbm_to_vmem [thread:$0]  %s851_s4, 512, %s73_s25, [#allocation9], %s670_s28, %s670_s28, %s671_s9  }
  0x68   :  { %s587_s18 = scalar_lea.hbm %s853_s6, 32 }
  0x69   :  { %p588_p6 = scmp.ne.s32.totalorder %s853_s6, %s587_s18  ;;  %p591_p7 = scmp.lt.u32.totalorder %s587_s18, %s853_s6 }
  0x6b   :  { %p593_p8 = pnand %p591_p7, %p588_p6 }
  0x6d   :  { %596 = shalt.err (!%p593_p8)
}
  0x6e   :  { %s597_s20 = scalar_lea.vmem %s96_s29, 32  ;;  %p602_p10 = scmp.lt.s32.totalorder %s96_s29, %s96_s29 }
  0x6f   :  { %p598_p9 = scmp.ne.s32.totalorder %s96_s29, %s597_s20  ;;  %p603_p11 = scmp.lt.s32.totalorder %s597_s20, %s597_s20 }
  0x71   :  { %p604_p12 = por %p603_p11, %p602_p10 }
  0x73   :  { %p605_p13 = pnand %p604_p12, %p598_p9 }
  0x75   :  { %608 = shalt.err (!%p605_p13)
}
  0x76   :  { %98 = dma.hbm_to_vmem [thread:$0]  %s853_s6, 32, %s96_s29, [#allocation12]  }
  0x77   :  { %s676_s9 = smov [#allocation14]   ;;  %s609_s16 = scalar_lea.hbm %s854_s7, 32 }
  0x78   :  { %s105_s24 = sshll.u32 %s676_s9, 4  ;;  %p610_p0 = scmp.ne.s32.totalorder %s854_s7, %s609_s16  ;;  %s106_s24 = int_to_ptr.vmem [resolvable:$true] %s105_s24 }
  0x79   :  { %p613_p1 = scmp.lt.u32.totalorder %s609_s16, %s854_s7 }
  0x7b   :  { %p615_p2 = pnand %p613_p1, %p610_p0 }
  0x7d   :  { %618 = shalt.err (!%p615_p2)
}
  0x7e   :  { %s619_s10 = scalar_lea.vmem %s106_s24, 32  ;;  %p624_p4 = scmp.lt.s32.totalorder %s106_s24, %s106_s24 }
  0x7f   :  { %p620_p3 = scmp.ne.s32.totalorder %s106_s24, %s619_s10  ;;  %p625_p5 = scmp.lt.s32.totalorder %s619_s10, %s619_s10 }
  0x81   :  { %p626_p6 = por %p625_p5, %p624_p4 }
  0x83   :  { %p627_p7 = pnand %p626_p6, %p620_p3 }
  0x85   :  { %630 = shalt.err (!%p627_p7)
}
  0x86   :  { %108 = dma.hbm_to_vmem [thread:$0]  %s854_s7, 32, %s106_s24, [#allocation15]  }
  0x87   :  { %653 = dma.done.wait [#allocation3], 128  }
  0x88   :  { %654 = vsyncadd [#allocation3], 4294967168 }
  0x89   :  { %655 = dma.done.wait [#allocation6], 384  }
  0x8a   :  { %656 = vsyncadd [#allocation6], 4294966912 }
  0x8b   :  { %657 = dma.done.wait [#allocation9], 768  }
  0x8c   :  { %658 = vsyncadd [#allocation9], 4294966528 }
  0x8d   :  { %659 = dma.done.wait [#allocation12], 64  }
  0x8e   :  { %660 = vsyncadd [#allocation12], 4294967232 }
  0x8f   :  { %661 = dma.done.wait [#allocation15], 32  }
  0x90   :  { %662 = vsyncadd [#allocation15], 4294967264  ;;  %v677_v0 = vmov 0   ;;  %v428_v1 = vld [vmem:[#allocation10 + $0x4] ss:$8 sps:$4 sm:$0xff]   ;;  %vm155_vm0 = vcmask 261120   ;;  %v209_v49 = vlaneseq }
  0x91   :  { %279 = vmatprep.mubr.bf16.mxu0 %v677_v0  ;;  %v430_v2 = vld [vmem:[#allocation10] ss:$8 sps:$4 sm:$0xff]   ;;  %247 = vmatprep.subr.bf16.mxu0 %v428_v1  ;;  %v431_v3 = vld [vmem:[#allocation10 + $0x14] ss:$8 sps:$4 sm:$0xff]   ;;  %v433_v4 = vld [vmem:[#allocation10 + $0x10] ss:$8 sps:$4 sm:$0xff]  }
  0x92   :  { %v134_v5 = vld [vmem:[#allocation2] sm:$0xf]  ;;  %248 = vmatpush1.bf16.msra.mxu0 %v430_v2  ;;  %v135_v6 = vld [vmem:[#allocation2 + $0x4] sm:$0xf]  ;;  %v136_v7 = vld [vmem:[#allocation5] sm:$0xf] }
  0x93   :  { %v137_v8 = vld [vmem:[#allocation5 + $0x4] sm:$0xf]  ;;  %249 = vmatprep.subr.bf16.mxu0 %v431_v3  ;;  %v151_v9 = vmul.bf16 %v136_v7, %v134_v5  ;;  %v404_v11 = vcombine.low %v134_v5, %v135_v6  ;;  %v138_v16 = vld [vmem:[#allocation7] sm:$0xff]  ;;  %v139_v19 = vld [vmem:[#allocation7 + $0x8] sm:$0xff]  ;;  %vm188_vm1 = vcmask 7168   ;;  %v210_v50 = vshrl.u32 %v209_v49, 7 }
  0x94   :  { %v152_v10 = vmul.bf16 %v137_v8, %v135_v6  ;;  %v140_v26 = vld [vmem:[#allocation8] sm:$0xff]  ;;  %v141_v31 = vld [vmem:[#allocation8 + $0x8] sm:$0xff]  ;;  %v205_v52 = vld [vmem:[#allocation11] sm:$0x3]  ;;  %s678_s13 = smov [#allocation16]  }
  0x95   :  { %v153_v12 = vunpack.c.l.bf16 %v151_v9  ;;  %v211_v51 = vsub.s32 0, %v210_v50  ;;  %v206_v62 = vld [vmem:[#allocation13] sm:$0x3]  ;;  %v207_v8 = vld [vmem:[#allocation14] sm:$0x3]  ;;  %s391_s5 = sshll.u32 %s678_s13, 4  ;;  %s392_s5 = int_to_ptr.vmem [resolvable:$true] %s391_s5 }
  0x96   :  { %v154_v13 = vunpack.c.l.bf16 %v152_v10  ;;  %250 = vmatpush1.bf16.msra.mxu0 %v433_v4  ;;  %s631_s27 = scalar_lea.vmem %s392_s5, 16  ;;  %s635_s22 = scalar_lea.vmem %s392_s5, 32 }
  0x97   :  { %v156_v14 = vsel %vm155_vm0, %v153_v12, 0.0  ;;  %v212_v53 = vrot.slane %v205_v52, %v211_v51  ;;  %v310_v1 = vrot.slane %v206_v62, %v211_v51  ;;  %v333_v9 = vrot.slane %v207_v8, %v211_v51  ;;  %p632_p8 = scmp.ne.s32.totalorder %s392_s5, %s631_s27  ;;  %p636_p9 = scmp.lt.s32.totalorder %s392_s5, %s392_s5 }
  0x98   :  { %157 = vadd.xlane.f32.xlu0 %v156_v14  ;;  %v159_v15 = vsel %vm155_vm0, %v154_v13, 0.0  ;;  %v349_v13 = vand.u32 127, %v209_v49  ;;  %p637_p10 = scmp.lt.s32.totalorder %s635_s22, %s631_s27 }
  0x99   :  { %409 = vmatmul.mubr.msk.bf16.vlgmr.msra.gmra.mrb[0].mxu0 %vm155_vm0, %v404_v11 }
  0x9a   :  { %vm351_vm2 = vcmp.lt.s32.totalorder %v349_v13, 16  ;;  %p638_p11 = por %p637_p10, %p636_p9 }
  0x9c   :  { %160 = vadd.xlane.f32.xlu0 %v159_v15  ;;  %p639_p12 = pnand %p638_p11, %p632_p8 }
 0x125   :  { %v158_v17 = vpop.xlane.xlu0 %157 }
 0x126   :  { %v162_v18 = vadd.f32 %v158_v17, %v138_v16 }
 0x128   :  { %v164_v20 = vmul.f32 1.442695, %v162_v18 }
 0x129   :  { %v161_v21 = vpop.xlane.xlu0 %160 }
 0x12a   :  { %435 = vpow2.f32 %v164_v20  ;;  %v163_v22 = vadd.f32 %v161_v21, %v139_v19 }
 0x12c   :  { %v166_v23 = vmul.f32 1.442695, %v163_v22 }
 0x12e   :  { %437 = vpow2.f32 %v166_v23 }
 0x134   :  { %v436_v24 = vpop.eup %435 }
 0x135   :  { %v168_v25 = vmax.f32 %v436_v24, 1e-09 }
 0x137   :  { %v170_v27 = vmin.f32 %v168_v25, 1.0 }
 0x138   :  { %v438_v28 = vpop.eup %437 }
 0x139   :  { %439 = vlog2.f32 %v170_v27  ;;  %v176_v29 = vadd.f32 %v170_v27, %v140_v26  ;;  %v169_v30 = vmax.f32 %v438_v28, 1e-09 }
 0x13b   :  { %441 = vlog2.f32 %v176_v29  ;;  %v171_v32 = vmin.f32 %v169_v30, 1.0 }
 0x13d   :  { %443 = vlog2.f32 %v171_v32  ;;  %v177_v33 = vadd.f32 %v171_v32, %v141_v31 }
 0x13f   :  { %445 = vlog2.f32 %v177_v33 }
 0x143   :  { %v440_v34 = vpop.eup %439 }
 0x144   :  { %v173_v35 = vmul.f32 0.6931472, %v440_v34 }
 0x145   :  { %v442_v36 = vpop.eup %441 }
 0x146   :  { %v179_v37 = vmul.f32 0.6931472, %v442_v36 }
 0x147   :  { %v444_v38 = vpop.eup %443 }
 0x148   :  { %v175_v39 = vmul.f32 0.6931472, %v444_v38  ;;  %v182_v40 = vsub.f32 %v173_v35, %v179_v37 }
 0x149   :  { %v446_v41 = vpop.eup %445 }
 0x14a   :  { %v181_v42 = vmul.f32 0.6931472, %v446_v41  ;;  %v184_v43 = vmax.f32 %v182_v40, -100.0 }
 0x14c   :  { %v183_v44 = vsub.f32 %v175_v39, %v181_v42  ;;  %v189_v46 = vsel %vm188_vm1, %v184_v43, 0.0 }
 0x14e   :  { %v185_v45 = vmax.f32 %v183_v44, -100.0 }
 0x150   :  { %v190_v47 = vsel %vm188_vm1, %v185_v45, 0.0 }
 0x151   :  { %v191_v48 = vadd.f32 %v190_v47, %v189_v46 }
 0x153   :  { %192 = vadd.xlane.f32.xlu1 %v191_v48 }
 0x16c   :  { %v281_v54 = vpop.f32.mrb[0].mxu0 }
 0x16d   :  { %v282_v55 = vadd.f32 %v281_v54, %v212_v53  ;;  %v283_v56 = vpop.f32.mrb[1].mxu0 }
 0x16e   :  { %v285_v57 = vpop.f32.mrb[2].mxu0 }
 0x16f   :  { %v290_v58 = vmul.f32 1.442695, %v282_v55  ;;  %v286_v59 = vadd.f32 %v285_v57, %v212_v53  ;;  %v287_v60 = vpop.f32.mrb[3].mxu0 }
 0x171   :  { %447 = vpow2.f32 %v290_v58  ;;  %v294_v61 = vmul.f32 1.442695, %v286_v59 }
 0x173   :  { %449 = vpow2.f32 %v294_v61 }
 0x17b   :  { %v448_v63 = vpop.eup %447 }
 0x17c   :  { %v298_v0 = vmax.f32 %v448_v63, 1e-09 }
 0x17d   :  { %v450_v2 = vpop.eup %449 }
 0x17e   :  { %v302_v3 = vmin.f32 %v298_v0, 1.0  ;;  %v300_v4 = vmax.f32 %v450_v2, 1e-09 }
 0x180   :  { %v317_v5 = vadd.f32 %v310_v1, %v302_v3  ;;  %v304_v6 = vmin.f32 %v300_v4, 1.0 }
 0x182   :  { %451 = vlog2.f32 %v317_v5  ;;  %v319_v7 = vadd.f32 %v310_v1, %v304_v6 }
 0x184   :  { %453 = vlog2.f32 %v319_v7 }
 0x18c   :  { %v452_v10 = vpop.eup %451 }
 0x18d   :  { %v322_v11 = vmul.f32 0.6931472, %v452_v10 }
 0x18e   :  { %v454_v12 = vpop.eup %453 }
 0x18f   :  { %v326_v14 = vmul.f32 0.6931472, %v454_v12  ;;  %v340_v15 = vsub.f32 %v333_v9, %v322_v11 }
 0x191   :  { %v342_v16 = vsub.f32 %v333_v9, %v326_v14  ;;  %v344_v17 = vmax.f32 %v340_v15, -100.0 }
 0x193   :  { %v346_v18 = vmax.f32 %v342_v16, -100.0  ;;  %v365_v19 = vsel %vm351_vm2, %v344_v17, 0.0 }
 0x195   :  { %v367_v20 = vsel %vm351_vm2, %v346_v18, 0.0 }
 0x196   :  { %v370_v21 = vadd.f32 %v367_v20, %v365_v19 }
 0x198   :  { %372 = vadd.xlane.f32.xlu1 %v370_v21 }
 0x1e0   :  { %v193_v22 = vpop.xlane.xlu1 %192 }
 0x1e1   :  { %v194_v23 = vrot.slane %v193_v22, 4 }
 0x1e3   :  { %v195_v24 = vadd.f32 %v194_v23, %v193_v22 }
 0x1e5   :  { %v196_v25 = vrot.slane %v195_v24, 2 }
 0x1e7   :  { %v197_v26 = vadd.f32 %v196_v25, %v195_v24 }
 0x1e9   :  { %v198_v27 = vrot.slane %v197_v26, 1 }
 0x1eb   :  { %v199_v28 = vadd.f32 %v198_v27, %v197_v26 }
 0x1ed   :  { %410 = vpush %v199_v28 }
 0x21e   :  { %s411_s7 = spop %410 }
 0x225   :  { %v373_v29 = vpop.xlane.xlu1 %372 }
 0x226   :  { %v374_v30 = vrot.slane %v373_v29, 4 }
 0x228   :  { %v375_v31 = vadd.f32 %v374_v30, %v373_v29 }
 0x22a   :  { %v376_v32 = vrot.slane %v375_v31, 2 }
 0x22c   :  { %v377_v33 = vadd.f32 %v376_v32, %v375_v31 }
 0x22e   :  { %v378_v34 = vrot.slane %v377_v33, 1 }
 0x230   :  { %v379_v35 = vadd.f32 %v378_v34, %v377_v33 }
 0x232   :  { %412 = vpush %v379_v35 }
 0x263   :  { %s413_s11 = spop %412 }
 0x264   :  { %s381_s12 = sadd.f32 %s413_s11, %s411_s7 }
 0x266   :  { %s382_s2 = ssub.f32 0.0, %s381_s12 }
 0x268   :  { %v383_v36 = vstv %s382_s2 }
 0x269   :  { %384 = vst [vmem:[#allocation16] sm:$0x1] %v383_v36 }
 0x26a   :  { %642 = shalt.err (!%p639_p12)
}
 0x26b   :  { %s643_s18 = scalar_lea.hbm %s855_s8, 16 }
 0x26c   :  { %p644_p13 = scmp.ne.s32.totalorder %s855_s8, %s643_s18  ;;  %p647_p0 = scmp.lt.u32.totalorder %s643_s18, %s855_s8 }
 0x26e   :  { %p649_p1 = pnand %p647_p0, %p644_p13 }
 0x270   :  { %652 = shalt.err (!%p649_p1)
}
 0x271   :  { %394 = dma.vmem_to_hbm [thread:$0]  %s392_s5, 16, %s855_s8, [#allocation4]  }
 0x272   :  { %663 = dma.done.wait [#allocation4], 16  }
 0x273   :  { %664 = vsyncadd [#allocation4], 4294967280 }
 0x274   :  { %398 = vsyncpa [#allocation3], 1 }
 0x275   :  { %399 = vsyncpa [#allocation6], 1 }
 0x276   :  { %400 = vsyncpa [#allocation9], 1 }
 0x277   :  { %401 = vsyncpa [#allocation12], 1 }
 0x278   :  { %402 = vsyncpa [#allocation15], 1 }
 0x279   :  { %403 = vsyncpa [#allocation4], 1 }

// kernel: tpu_custom_call.1
= control target key start
LH: loop header
LB: loop body
LE: loop exit
PB: predicated region body
PF: predicated region fallthrough
CT: control target
= control target key end

     0   :  { %13 = vsyncpa [#allocation3], 0  ;;  %s847_s0 = inlined_call_operand.hbm [shape: bf16[16,32], index: 0, kind: input, shape index: {}]   ;;  %s848_s1 = inlined_call_operand.hbm [shape: bf16[16,32], index: 1, kind: input, shape index: {}]   ;;  %s849_s2 = inlined_call_operand.hbm [shape: f32[16,1], index: 2, kind: input, shape index: {}]   ;;  %s850_s3 = inlined_call_operand.hbm [shape: f32[16,1], index: 3, kind: input, shape index: {}]   ;;  %s851_s4 = inlined_call_operand.hbm [shape: bf16[32,256], index: 4, kind: input, shape index: {}]   ;;  %s852_s5 = inlined_call_operand.hbm [shape: f32[1,256], index: 5, kind: input, shape index: {}]   ;;  %s853_s6 = inlined_call_operand.hbm [shape: f32[1,256], index: 6, kind: input, shape index: {}]   ;;  %s854_s7 = inlined_call_operand.hbm [shape: f32[1,256], index: 7, kind: input, shape index: {}]   ;;  %s855_s8 = inlined_call_operand.hbm [shape: f32[1,1,128], index: 8, kind: output, shape index: {}]  }
   0x1   :  { %14 = vsyncpa [#allocation6], 0 }
   0x2   :  { %15 = vsyncpa [#allocation9], 0 }
   0x3   :  { %16 = vsyncpa [#allocation12], 0 }
   0x4   :  { %17 = vsyncpa [#allocation15], 0 }
   0x5   :  { %18 = vsyncpa [#allocation4], 0  ;;  %s665_s27 = smov [#allocation5]   ;;  %s455_s9 = scalar_lea.hbm %s848_s1, 128 }
   0x6   :  { %s36_s28 = sshll.u32 %s665_s27, 4  ;;  %p456_p0 = scmp.ne.s32.totalorder %s848_s1, %s455_s9  ;;  %s37_s28 = int_to_ptr.vmem [resolvable:$true] %s36_s28 }
   0x7   :  { %p459_p1 = scmp.lt.u32.totalorder %s455_s9, %s848_s1 }
   0x9   :  { %p461_p2 = pnand %p459_p1, %p456_p0 }
   0xb   :  { %464 = shalt.err (!%p461_p2)
}
   0xc   :  { %s465_s14 = scalar_lea.vmem %s37_s28, 128  ;;  %p470_p4 = scmp.lt.s32.totalorder %s37_s28, %s37_s28 }
   0xd   :  { %p466_p3 = scmp.ne.s32.totalorder %s37_s28, %s465_s14  ;;  %p471_p5 = scmp.lt.s32.totalorder %s465_s14, %s465_s14 }
   0xf   :  { %p472_p6 = por %p471_p5, %p470_p4 }
  0x11   :  { %p473_p7 = pnand %p472_p6, %p466_p3 }
  0x13   :  { %476 = shalt.err (!%p473_p7)
}
  0x14   :  { %s666_s15 = smov 64   ;;  %s667_s16 = smov 4  }
  0x15   :  { %42 = dma.hbm_to_vmem [thread:$0]  %s848_s1, 128, %s37_s28, [#allocation6], %s666_s15, %s666_s15, %s667_s16  }
  0x16   :  { %s668_s19 = smov [#allocation8]   ;;  %s669_s21 = smov [#allocation11]  }
  0x17   :  { %s60_s20 = sshll.u32 %s668_s19, 4  ;;  %s85_s22 = sshll.u32 %s669_s21, 4  ;;  %s61_s20 = int_to_ptr.vmem [resolvable:$true] %s60_s20  ;;  %s86_s22 = int_to_ptr.vmem [resolvable:$true] %s85_s22 }
  0x18   :  { %s477_s25 = scalar_lea.hbm %s850_s3, 256 }
  0x19   :  { %p478_p8 = scmp.ne.s32.totalorder %s850_s3, %s477_s25  ;;  %p481_p9 = scmp.lt.u32.totalorder %s477_s25, %s850_s3 }
  0x1b   :  { %p483_p10 = pnand %p481_p9, %p478_p8 }
  0x1d   :  { %486 = shalt.err (!%p483_p10)
}
  0x1e   :  { %s487_s1 = scalar_lea.vmem %s61_s20, 256  ;;  %p492_p12 = scmp.lt.s32.totalorder %s61_s20, %s61_s20 }
  0x1f   :  { %p488_p11 = scmp.ne.s32.totalorder %s61_s20, %s487_s1  ;;  %p493_p13 = scmp.lt.s32.totalorder %s487_s1, %s487_s1 }
  0x21   :  { %p494_p0 = por %p493_p13, %p492_p12 }
  0x23   :  { %p495_p1 = pnand %p494_p0, %p488_p11 }
  0x25   :  { %498 = shalt.err (!%p495_p1)
}
  0x26   :  { %s670_s28 = smov 128   ;;  %s671_s9 = smov 8  }
  0x27   :  { %66 = dma.hbm_to_vmem [thread:$0]  %s850_s3, 256, %s61_s20, [#allocation9], %s670_s28, %s670_s28, %s671_s9  }
  0x28   :  { %s499_s14 = scalar_lea.hbm %s852_s5, 32 }
  0x29   :  { %p500_p2 = scmp.ne.s32.totalorder %s852_s5, %s499_s14  ;;  %p503_p3 = scmp.lt.u32.totalorder %s499_s14, %s852_s5 }
  0x2b   :  { %p505_p4 = pnand %p503_p3, %p500_p2 }
  0x2d   :  { %508 = shalt.err (!%p505_p4)
}
  0x2e   :  { %s509_s23 = scalar_lea.vmem %s86_s22, 32  ;;  %p514_p6 = scmp.lt.s32.totalorder %s86_s22, %s86_s22 }
  0x2f   :  { %p510_p5 = scmp.ne.s32.totalorder %s86_s22, %s509_s23  ;;  %p515_p7 = scmp.lt.s32.totalorder %s509_s23, %s509_s23 }
  0x31   :  { %p516_p8 = por %p515_p7, %p514_p6 }
  0x33   :  { %p517_p9 = pnand %p516_p8, %p510_p5 }
  0x35   :  { %520 = shalt.err (!%p517_p9)
}
  0x36   :  { %88 = dma.hbm_to_vmem [thread:$0]  %s852_s5, 32, %s86_s22, [#allocation12]  }
  0x37   :  { %s672_s24 = smov [#allocation2]   ;;  %s673_s26 = smov [#allocation7]  }
  0x38   :  { %s24_s25 = sshll.u32 %s672_s24, 4  ;;  %s48_s27 = sshll.u32 %s673_s26, 4  ;;  %s25_s25 = int_to_ptr.vmem [resolvable:$true] %s24_s25  ;;  %s49_s27 = int_to_ptr.vmem [resolvable:$true] %s48_s27 }
  0x39   :  { %s521_s1 = scalar_lea.hbm %s847_s0, 128 }
  0x3a   :  { %p522_p10 = scmp.ne.s32.totalorder %s847_s0, %s521_s1  ;;  %p525_p11 = scmp.lt.u32.totalorder %s521_s1, %s847_s0 }
  0x3c   :  { %p527_p12 = pnand %p525_p11, %p522_p10 }
  0x3e   :  { %530 = shalt.err (!%p527_p12)
}
  0x3f   :  { %s531_s5 = scalar_lea.vmem %s25_s25, 128  ;;  %p536_p0 = scmp.lt.s32.totalorder %s25_s25, %s25_s25 }
  0x40   :  { %p532_p13 = scmp.ne.s32.totalorder %s25_s25, %s531_s5  ;;  %p537_p1 = scmp.lt.s32.totalorder %s531_s5, %s531_s5 }
  0x42   :  { %p538_p2 = por %p537_p1, %p536_p0 }
  0x44   :  { %p539_p3 = pnand %p538_p2, %p532_p13 }
  0x46   :  { %542 = shalt.err (!%p539_p3)
}
  0x47   :  { %30 = dma.hbm_to_vmem [thread:$0]  %s847_s0, 128, %s25_s25, [#allocation3], %s666_s15, %s666_s15, %s667_s16  }
  0x48   :  { %s543_s19 = scalar_lea.hbm %s849_s2, 256 }
  0x49   :  { %p544_p4 = scmp.ne.s32.totalorder %s849_s2, %s543_s19  ;;  %p547_p5 = scmp.lt.u32.totalorder %s543_s19, %s849_s2 }
  0x4b   :  { %p549_p6 = pnand %p547_p5, %p544_p4 }
  0x4d   :  { %552 = shalt.err (!%p549_p6)
}
  0x4e   :  { %s553_s24 = scalar_lea.vmem %s49_s27, 256  ;;  %p558_p8 = scmp.lt.s32.totalorder %s49_s27, %s49_s27 }
  0x4f   :  { %p554_p7 = scmp.ne.s32.totalorder %s49_s27, %s553_s24  ;;  %p559_p9 = scmp.lt.s32.totalorder %s553_s24, %s553_s24 }
  0x51   :  { %p560_p10 = por %p559_p9, %p558_p8 }
  0x53   :  { %p561_p11 = pnand %p560_p10, %p554_p7 }
  0x55   :  { %564 = shalt.err (!%p561_p11)
}
  0x56   :  { %54 = dma.hbm_to_vmem [thread:$0]  %s849_s2, 256, %s49_s27, [#allocation6], %s670_s28, %s670_s28, %s671_s9  }
  0x57   :  { %s674_s16 = smov [#allocation10]   ;;  %s675_s26 = smov [#allocation13]  }
  0x58   :  { %s72_s25 = sshll.u32 %s674_s16, 4  ;;  %s95_s29 = sshll.u32 %s675_s26, 4  ;;  %s73_s25 = int_to_ptr.vmem [resolvable:$true] %s72_s25  ;;  %s96_s29 = int_to_ptr.vmem [resolvable:$true] %s95_s29 }
  0x59   :  { %s565_s10 = scalar_lea.hbm %s851_s4, 512 }
  0x5a   :  { %p566_p12 = scmp.ne.s32.totalorder %s851_s4, %s565_s10  ;;  %p569_p13 = scmp.lt.u32.totalorder %s565_s10, %s851_s4 }
  0x5c   :  { %p571_p0 = pnand %p569_p13, %p566_p12 }
  0x5e   :  { %574 = shalt.err (!%p571_p0)
}
  0x5f   :  { %s575_s2 = scalar_lea.vmem %s73_s25, 512  ;;  %p580_p2 = scmp.lt.s32.totalorder %s73_s25, %s73_s25 }
  0x60   :  { %p576_p1 = scmp.ne.s32.totalorder %s73_s25, %s575_s2  ;;  %p581_p3 = scmp.lt.s32.totalorder %s575_s2, %s575_s2 }
  0x62   :  { %p582_p4 = por %p581_p3, %p580_p2 }
  0x64   :  { %p583_p5 = pnand %p582_p4, %p576_p1 }
  0x66   :  { %586 = shalt.err (!%p583_p5)
}
  0x67   :  { %78 = dma.hbm_to_vmem [thread:$0]  %s851_s4, 512, %s73_s25, [#allocation9], %s670_s28, %s670_s28, %s671_s9  }
  0x68   :  { %s587_s18 = scalar_lea.hbm %s853_s6, 32 }
  0x69   :  { %p588_p6 = scmp.ne.s32.totalorder %s853_s6, %s587_s18  ;;  %p591_p7 = scmp.lt.u32.totalorder %s587_s18, %s853_s6 }
  0x6b   :  { %p593_p8 = pnand %p591_p7, %p588_p6 }
  0x6d   :  { %596 = shalt.err (!%p593_p8)
}
  0x6e   :  { %s597_s20 = scalar_lea.vmem %s96_s29, 32  ;;  %p602_p10 = scmp.lt.s32.totalorder %s96_s29, %s96_s29 }
  0x6f   :  { %p598_p9 = scmp.ne.s32.totalorder %s96_s29, %s597_s20  ;;  %p603_p11 = scmp.lt.s32.totalorder %s597_s20, %s597_s20 }
  0x71   :  { %p604_p12 = por %p603_p11, %p602_p10 }
  0x73   :  { %p605_p13 = pnand %p604_p12, %p598_p9 }
  0x75   :  { %608 = shalt.err (!%p605_p13)
}
  0x76   :  { %98 = dma.hbm_to_vmem [thread:$0]  %s853_s6, 32, %s96_s29, [#allocation12]  }
  0x77   :  { %s676_s9 = smov [#allocation14]   ;;  %s609_s16 = scalar_lea.hbm %s854_s7, 32 }
  0x78   :  { %s105_s24 = sshll.u32 %s676_s9, 4  ;;  %p610_p0 = scmp.ne.s32.totalorder %s854_s7, %s609_s16  ;;  %s106_s24 = int_to_ptr.vmem [resolvable:$true] %s105_s24 }
  0x79   :  { %p613_p1 = scmp.lt.u32.totalorder %s609_s16, %s854_s7 }
  0x7b   :  { %p615_p2 = pnand %p613_p1, %p610_p0 }
  0x7d   :  { %618 = shalt.err (!%p615_p2)
}
  0x7e   :  { %s619_s10 = scalar_lea.vmem %s106_s24, 32  ;;  %p624_p4 = scmp.lt.s32.totalorder %s106_s24, %s106_s24 }
  0x7f   :  { %p620_p3 = scmp.ne.s32.totalorder %s106_s24, %s619_s10  ;;  %p625_p5 = scmp.lt.s32.totalorder %s619_s10, %s619_s10 }
  0x81   :  { %p626_p6 = por %p625_p5, %p624_p4 }
  0x83   :  { %p627_p7 = pnand %p626_p6, %p620_p3 }
  0x85   :  { %630 = shalt.err (!%p627_p7)
}
  0x86   :  { %108 = dma.hbm_to_vmem [thread:$0]  %s854_s7, 32, %s106_s24, [#allocation15]  }
  0x87   :  { %653 = dma.done.wait [#allocation3], 128  }
  0x88   :  { %654 = vsyncadd [#allocation3], 4294967168 }
  0x89   :  { %655 = dma.done.wait [#allocation6], 384  }
  0x8a   :  { %656 = vsyncadd [#allocation6], 4294966912 }
  0x8b   :  { %657 = dma.done.wait [#allocation9], 768  }
  0x8c   :  { %658 = vsyncadd [#allocation9], 4294966528 }
  0x8d   :  { %659 = dma.done.wait [#allocation12], 64  }
  0x8e   :  { %660 = vsyncadd [#allocation12], 4294967232 }
  0x8f   :  { %661 = dma.done.wait [#allocation15], 32  }
  0x90   :  { %662 = vsyncadd [#allocation15], 4294967264  ;;  %v677_v0 = vmov 0   ;;  %v428_v1 = vld [vmem:[#allocation10 + $0x4] ss:$8 sps:$4 sm:$0xff]   ;;  %vm155_vm0 = vcmask 261120   ;;  %v209_v49 = vlaneseq }
  0x91   :  { %279 = vmatprep.mubr.bf16.mxu0 %v677_v0  ;;  %v430_v2 = vld [vmem:[#allocation10] ss:$8 sps:$4 sm:$0xff]   ;;  %247 = vmatprep.subr.bf16.mxu0 %v428_v1  ;;  %v431_v3 = vld [vmem:[#allocation10 + $0x14] ss:$8 sps:$4 sm:$0xff]   ;;  %v433_v4 = vld [vmem:[#allocation10 + $0x10] ss:$8 sps:$4 sm:$0xff]  }
  0x92   :  { %v134_v5 = vld [vmem:[#allocation2] sm:$0xf]  ;;  %248 = vmatpush1.bf16.msra.mxu0 %v430_v2  ;;  %v135_v6 = vld [vmem:[#allocation2 + $0x4] sm:$0xf]  ;;  %v136_v7 = vld [vmem:[#allocation5] sm:$0xf] }
  0x93   :  { %v137_v8 = vld [vmem:[#allocation5 + $0x4] sm:$0xf]  ;;  %249 = vmatprep.subr.bf16.mxu0 %v431_v3  ;;  %v151_v9 = vmul.bf16 %v136_v7, %v134_v5  ;;  %v404_v11 = vcombine.low %v134_v5, %v135_v6  ;;  %v138_v16 = vld [vmem:[#allocation7] sm:$0xff]  ;;  %v139_v19 = vld [vmem:[#allocation7 + $0x8] sm:$0xff]  ;;  %vm188_vm1 = vcmask 7168   ;;  %v210_v50 = vshrl.u32 %v209_v49, 7 }
  0x94   :  { %v152_v10 = vmul.bf16 %v137_v8, %v135_v6  ;;  %v140_v26 = vld [vmem:[#allocation8] sm:$0xff]  ;;  %v141_v31 = vld [vmem:[#allocation8 + $0x8] sm:$0xff]  ;;  %v205_v52 = vld [vmem:[#allocation11] sm:$0x3]  ;;  %s678_s13 = smov [#allocation16]  }
  0x95   :  { %v153_v12 = vunpack.c.l.bf16 %v151_v9  ;;  %v211_v51 = vsub.s32 0, %v210_v50  ;;  %v206_v62 = vld [vmem:[#allocation13] sm:$0x3]  ;;  %v207_v8 = vld [vmem:[#allocation14] sm:$0x3]  ;;  %s391_s5 = sshll.u32 %s678_s13, 4  ;;  %s392_s5 = int_to_ptr.vmem [resolvable:$true] %s391_s5 }
  0x96   :  { %v154_v13 = vunpack.c.l.bf16 %v152_v10  ;;  %250 = vmatpush1.bf16.msra.mxu0 %v433_v4  ;;  %s631_s27 = scalar_lea.vmem %s392_s5, 16  ;;  %s635_s22 = scalar_lea.vmem %s392_s5, 32 }
  0x97   :  { %v156_v14 = vsel %vm155_vm0, %v153_v12, 0.0  ;;  %v212_v53 = vrot.slane %v205_v52, %v211_v51  ;;  %v310_v1 = vrot.slane %v206_v62, %v211_v51  ;;  %v333_v9 = vrot.slane %v207_v8, %v211_v51  ;;  %p632_p8 = scmp.ne.s32.totalorder %s392_s5, %s631_s27  ;;  %p636_p9 = scmp.lt.s32.totalorder %s392_s5, %s392_s5 }
  0x98   :  { %157 = vadd.xlane.f32.xlu0 %v156_v14  ;;  %v159_v15 = vsel %vm155_vm0, %v154_v13, 0.0  ;;  %v349_v13 = vand.u32 127, %v209_v49  ;;  %p637_p10 = scmp.lt.s32.totalorder %s635_s22, %s631_s27 }
  0x99   :  { %409 = vmatmul.mubr.msk.bf16.vlgmr.msra.gmra.mrb[0].mxu0 %vm155_vm0, %v404_v11 }
  0x9a   :  { %vm351_vm2 = vcmp.lt.s32.totalorder %v349_v13, 16  ;;  %p638_p11 = por %p637_p10, %p636_p9 }
  0x9c   :  { %160 = vadd.xlane.f32.xlu0 %v159_v15  ;;  %p639_p12 = pnand %p638_p11, %p632_p8 }
 0x125   :  { %v158_v17 = vpop.xlane.xlu0 %157 }
 0x126   :  { %v162_v18 = vadd.f32 %v158_v17, %v138_v16 }
 0x128   :  { %v164_v20 = vmul.f32 1.442695, %v162_v18 }
 0x129   :  { %v161_v21 = vpop.xlane.xlu0 %160 }
 0x12a   :  { %435 = vpow2.f32 %v164_v20  ;;  %v163_v22 = vadd.f32 %v161_v21, %v139_v19 }
 0x12c   :  { %v166_v23 = vmul.f32 1.442695, %v163_v22 }
 0x12e   :  { %437 = vpow2.f32 %v166_v23 }
 0x134   :  { %v436_v24 = vpop.eup %435 }
 0x135   :  { %v168_v25 = vmax.f32 %v436_v24, 1e-09 }
 0x137   :  { %v170_v27 = vmin.f32 %v168_v25, 1.0 }
 0x138   :  { %v438_v28 = vpop.eup %437 }
 0x139   :  { %439 = vlog2.f32 %v170_v27  ;;  %v176_v29 = vadd.f32 %v170_v27, %v140_v26  ;;  %v169_v30 = vmax.f32 %v438_v28, 1e-09 }
 0x13b   :  { %441 = vlog2.f32 %v176_v29  ;;  %v171_v32 = vmin.f32 %v169_v30, 1.0 }
 0x13d   :  { %443 = vlog2.f32 %v171_v32  ;;  %v177_v33 = vadd.f32 %v171_v32, %v141_v31 }
 0x13f   :  { %445 = vlog2.f32 %v177_v33 }
 0x143   :  { %v440_v34 = vpop.eup %439 }
 0x144   :  { %v173_v35 = vmul.f32 0.6931472, %v440_v34 }
 0x145   :  { %v442_v36 = vpop.eup %441 }
 0x146   :  { %v179_v37 = vmul.f32 0.6931472, %v442_v36 }
 0x147   :  { %v444_v38 = vpop.eup %443 }
 0x148   :  { %v175_v39 = vmul.f32 0.6931472, %v444_v38  ;;  %v182_v40 = vsub.f32 %v173_v35, %v179_v37 }
 0x149   :  { %v446_v41 = vpop.eup %445 }
 0x14a   :  { %v181_v42 = vmul.f32 0.6931472, %v446_v41  ;;  %v184_v43 = vmax.f32 %v182_v40, -100.0 }
 0x14c   :  { %v183_v44 = vsub.f32 %v175_v39, %v181_v42  ;;  %v189_v46 = vsel %vm188_vm1, %v184_v43, 0.0 }
 0x14e   :  { %v185_v45 = vmax.f32 %v183_v44, -100.0 }
 0x150   :  { %v190_v47 = vsel %vm188_vm1, %v185_v45, 0.0 }
 0x151   :  { %v191_v48 = vadd.f32 %v190_v47, %v189_v46 }
 0x153   :  { %192 = vadd.xlane.f32.xlu1 %v191_v48 }
 0x16c   :  { %v281_v54 = vpop.f32.mrb[0].mxu0 }
 0x16d   :  { %v282_v55 = vadd.f32 %v281_v54, %v212_v53  ;;  %v283_v56 = vpop.f32.mrb[1].mxu0 }
 0x16e   :  { %v285_v57 = vpop.f32.mrb[2].mxu0 }
 0x16f   :  { %v290_v58 = vmul.f32 1.442695, %v282_v55  ;;  %v286_v59 = vadd.f32 %v285_v57, %v212_v53  ;;  %v287_v60 = vpop.f32.mrb[3].mxu0 }
 0x171   :  { %447 = vpow2.f32 %v290_v58  ;;  %v294_v61 = vmul.f32 1.442695, %v286_v59 }
 0x173   :  { %449 = vpow2.f32 %v294_v61 }
 0x17b   :  { %v448_v63 = vpop.eup %447 }
 0x17c   :  { %v298_v0 = vmax.f32 %v448_v63, 1e-09 }
 0x17d   :  { %v450_v2 = vpop.eup %449 }
 0x17e   :  { %v302_v3 = vmin.f32 %v298_v0, 1.0  ;;  %v300_v4 = vmax.f32 %v450_v2, 1e-09 }
 0x180   :  { %v317_v5 = vadd.f32 %v310_v1, %v302_v3  ;;  %v304_v6 = vmin.f32 %v300_v4, 1.0 }
 0x182   :  { %451 = vlog2.f32 %v317_v5  ;;  %v319_v7 = vadd.f32 %v310_v1, %v304_v6 }
 0x184   :  { %453 = vlog2.f32 %v319_v7 }
 0x18c   :  { %v452_v10 = vpop.eup %451 }
 0x18d   :  { %v322_v11 = vmul.f32 0.6931472, %v452_v10 }
 0x18e   :  { %v454_v12 = vpop.eup %453 }
 0x18f   :  { %v326_v14 = vmul.f32 0.6931472, %v454_v12  ;;  %v340_v15 = vsub.f32 %v333_v9, %v322_v11 }
 0x191   :  { %v342_v16 = vsub.f32 %v333_v9, %v326_v14  ;;  %v344_v17 = vmax.f32 %v340_v15, -100.0 }
 0x193   :  { %v346_v18 = vmax.f32 %v342_v16, -100.0  ;;  %v365_v19 = vsel %vm351_vm2, %v344_v17, 0.0 }
 0x195   :  { %v367_v20 = vsel %vm351_vm2, %v346_v18, 0.0 }
 0x196   :  { %v370_v21 = vadd.f32 %v367_v20, %v365_v19 }
 0x198   :  { %372 = vadd.xlane.f32.xlu1 %v370_v21 }
 0x1e0   :  { %v193_v22 = vpop.xlane.xlu1 %192 }
 0x1e1   :  { %v194_v23 = vrot.slane %v193_v22, 4 }
 0x1e3   :  { %v195_v24 = vadd.f32 %v194_v23, %v193_v22 }
 0x1e5   :  { %v196_v25 = vrot.slane %v195_v24, 2 }
 0x1e7   :  { %v197_v26 = vadd.f32 %v196_v25, %v195_v24 }
 0x1e9   :  { %v198_v27 = vrot.slane %v197_v26, 1 }
 0x1eb   :  { %v199_v28 = vadd.f32 %v198_v27, %v197_v26 }
 0x1ed   :  { %410 = vpush %v199_v28 }
 0x21e   :  { %s411_s7 = spop %410 }
 0x225   :  { %v373_v29 = vpop.xlane.xlu1 %372 }
 0x226   :  { %v374_v30 = vrot.slane %v373_v29, 4 }
 0x228   :  { %v375_v31 = vadd.f32 %v374_v30, %v373_v29 }
 0x22a   :  { %v376_v32 = vrot.slane %v375_v31, 2 }
 0x22c   :  { %v377_v33 = vadd.f32 %v376_v32, %v375_v31 }
 0x22e   :  { %v378_v34 = vrot.slane %v377_v33, 1 }
 0x230   :  { %v379_v35 = vadd.f32 %v378_v34, %v377_v33 }
 0x232   :  { %412 = vpush %v379_v35 }
 0x263   :  { %s413_s11 = spop %412 }
 0x264   :  { %s381_s12 = sadd.f32 %s413_s11, %s411_s7 }
 0x266   :  { %s382_s2 = ssub.f32 0.0, %s381_s12 }
 0x268   :  { %v383_v36 = vstv %s382_s2 }
 0x269   :  { %384 = vst [vmem:[#allocation16] sm:$0x1] %v383_v36 }
 0x26a   :  { %642 = shalt.err (!%p639_p12)
}
 0x26b   :  { %s643_s18 = scalar_lea.hbm %s855_s8, 16 }
 0x26c   :  { %p644_p13 = scmp.ne.s32.totalorder %s855_s8, %s643_s18  ;;  %p647_p0 = scmp.lt.u32.totalorder %s643_s18, %s855_s8 }
 0x26e   :  { %p649_p1 = pnand %p647_p0, %p644_p13 }
 0x270   :  { %652 = shalt.err (!%p649_p1)
}
 0x271   :  { %394 = dma.vmem_to_hbm [thread:$0]  %s392_s5, 16, %s855_s8, [#allocation4]  }
 0x272   :  { %663 = dma.done.wait [#allocation4], 16  }
 0x273   :  { %664 = vsyncadd [#allocation4], 4294967280 }
 0x274   :  { %398 = vsyncpa [#allocation3], 1 }
 0x275   :  { %399 = vsyncpa [#allocation6], 1 }
 0x276   :  { %400 = vsyncpa [#allocation9], 1 }
 0x277   :  { %401 = vsyncpa [#allocation12], 1 }
 0x278   :  { %402 = vsyncpa [#allocation15], 1 }
 0x279   :  { %403 = vsyncpa [#allocation4], 1 }

</bundles_post_ra>
